<compile_context>
chip_gen: v5e
topology: v5e:2x2
jax: 0.10.0
libtpu: 0.0.40
codegen_flags: <defaults>
</compile_context>

<pallas_src>
import math

import jax
import jax.numpy as jnp
from jax.experimental import pallas as pl
from jax.experimental.pallas import tpu as pltpu


def _conv_relu(x, w, bias):
    """Depthwise conv1d (k=3, pad=1, groups=C) + ReLU on a (Bb, N, Cb) tile."""
    Bb, N, Cb = x.shape
    dt = x.dtype
    if N > 1 and N % 8 == 0:
        # Shifts as XLU sublane rotations (no full-tile vld/vst copies); the wrapped
        # boundary row is zeroed with a (1, N, 1) edge-mask multiply (1 VPU op/elem).
        row = jax.lax.broadcasted_iota(jnp.int32, (1, N, 1), 1)
        x_prev = pltpu.roll(x, 1, axis=1) * (row > 0).astype(dt)        # x[n-1]
        x_next = pltpu.roll(x, N - 1, axis=1) * (row < N - 1).astype(dt)  # x[n+1]
    else:
        # Token count not sublane-aligned: zero-padded slice+concat fallback.
        zero_row = jnp.zeros((Bb, 1, Cb), dt)
        x_prev = jnp.concatenate([zero_row, x[:, :N - 1, :]], axis=1)
        x_next = jnp.concatenate([x[:, 1:, :], zero_row], axis=1)
    y = x_prev * w[0:1, :] + x * w[1:2, :] + x_next * w[2:3, :] + bias
    return jnp.maximum(y, 0.0)


def _temporal_kernel(x_ref, w_ref, b_ref, o_ref):
    """Conv+ReLU then AdaptiveAvgPool1d via static per-token segment means."""
    # bf16 inputs: keep the elementwise pipeline in bf16 (native VPU on v6e/v7x,
    # halves VMEM / load-store bytes); accumulate the pool in f32.
    cdt = jnp.bfloat16 if x_ref.dtype == jnp.bfloat16 else jnp.float32
    x = x_ref[...].astype(cdt)          # (Bb, N, Cb)
    w = w_ref[...].astype(cdt)          # (3, Cb)
    bias = b_ref[...].astype(cdt)       # (1, Cb)
    y = _conv_relu(x, w, bias)          # (Bb, N, Cb)

    N = y.shape[1]
    T = o_ref.shape[1]
    for t in range(T):
        # nn.AdaptiveAvgPool1d segment: [floor(t*N/T), ceil((t+1)*N/T)) — static ints.
        start = (t * N) // T
        end = -(-((t + 1) * N) // T)
        seg = y[:, start:end, :].astype(jnp.float32)
        mean = jnp.sum(seg, axis=1) * (1.0 / float(end - start))        # (Bb, Cb)
        o_ref[:, t, :] = mean.astype(o_ref.dtype)


def _select_tiles(B, N, C, T, in_itemsize, compute_itemsize, budget_bytes):
    """Pick (b_blk, c_blk) so live VMEM (incl. in-kernel temps) fits the budget."""

    def live_bytes(b_blk, c_blk):
        elems = b_blk * N * c_blk
        return (2 * elems * in_itemsize           # double-buffered input
                + 4 * elems * compute_itemsize    # x_prev / x_next / fma temps / y
                + elems * 4                       # f32 pool-accumulation temp
                + 2 * b_blk * T * c_blk * 4)      # double-buffered output (<= f32)

    TARGET_IN_TILE = 6 << 20   # ~4-8 MiB per-step input slab amortizes per-step overhead

    # Channel-block candidates: full C always legal; if C % 128 == 0, any divisor
    # that is a multiple of 128 (conv/pool are per-channel -> no halo needed on C).
    cands = [C]
    if C % 128 == 0:
        m = C // 128
        cands = sorted({128 * d for d in range(1, m + 1) if m % d == 0}, reverse=True)

    # Largest channel block whose single-batch slab fits the VMEM budget.
    c_blk = cands[-1]
    for c in cands:
        if live_bytes(1, c) <= budget_bytes:
            c_blk = c
            break
    # Shrink further only to approach the tile target, never below 512 channels
    # (keep >= 2 KiB contiguous per DMA row for HBM burst efficiency).
    i = cands.index(c_blk)
    while (N * c_blk * in_itemsize > 2 * TARGET_IN_TILE
           and i + 1 < len(cands) and cands[i + 1] >= 512):
        i += 1
        c_blk = cands[i]

    # Batch block: as many batch elements per step as budget + tile target allow.
    per_b_live = live_bytes(1, c_blk)
    per_b_in = N * c_blk * in_itemsize
    b_blk = min(B,
                max(1, budget_bytes // per_b_live),
                max(1, TARGET_IN_TILE // per_b_in))
    while B % b_blk:
        b_blk -= 1
    return b_blk, c_blk


def temporal_extractor(features, conv_weight, conv_bias, num_temporal_tokens=4):
    """
    Args:
        features:    (B, N, C) float32 or bfloat16
        conv_weight: (C, 1, 3) float32  -- PyTorch Conv1d(groups=C) weight layout
        conv_bias:   (C,)      float32
    Returns:
        (B, num_temporal_tokens, C), dtype of `features`
    """
    B, N, C = features.shape
    T = int(num_temporal_tokens)
    in_itemsize = jnp.dtype(features.dtype).itemsize
    compute_itemsize = 2 if features.dtype == jnp.bfloat16 else 4

    # Params lane-major (C last); stored f32 in HBM, cast to compute dtype on-chip.
    w_kc = jnp.transpose(conv_weight[:, 0, :], (1, 0)).astype(jnp.float32)   # (3, C)
    bias_1c = conv_bias.reshape(1, C).astype(jnp.float32)                    # (1, C)

    # --------- explicit VMEM limit + tile budget (counts in-kernel temps) ---------
    try:
        vmem_cap = int(pltpu.get_tpu_info().vmem_capacity_bytes)
        vmem_limit = min((vmem_cap * 3) // 4, 96 * 1024 * 1024)   # v7x ~48 MiB, v5e/v6e ~96 MiB
    except Exception:
        vmem_limit = 48 * 1024 * 1024                             # safe on every generation
    budget = (vmem_limit * 3) // 4                                # headroom for compiler scratch

    b_blk, c_blk = _select_tiles(B, N, C, T, in_itemsize, compute_itemsize, budget)
    grid = (B // b_blk, C // c_blk)

    # Advisory cost estimate: ~3 FMA + relu + boundary masks + pool per element.
    cost = pl.CostEstimate(
        flops=10 * B * N * C,
        transcendentals=0,
        bytes_accessed=(B * N * C + B * T * C) * in_itemsize + 4 * C * 4,
    )

    x_spec = pl.BlockSpec((b_blk, N, c_blk), lambda b, c: (b, 0, c))
    w_spec = pl.BlockSpec((3, c_blk), lambda b, c: (0, c))
    b_spec = pl.BlockSpec((1, c_blk), lambda b, c: (0, c))
    o_spec = pl.BlockSpec((b_blk, T, c_blk), lambda b, c: (b, 0, c))

    return pl.pallas_call(
        _temporal_kernel,
        out_shape=jax.ShapeDtypeStruct((B, T, C), features.dtype),
        grid_spec=pltpu.PrefetchScalarGridSpec(
            num_scalar_prefetch=0,
            grid=grid,
            in_specs=[x_spec, w_spec, b_spec],
            out_specs=o_spec,
        ),
        compiler_params=pltpu.CompilerParams(
            dimension_semantics=("parallel", "parallel"),
            vmem_limit_bytes=vmem_limit,
        ),
        cost_estimate=cost,
    )(features, w_kc, bias_1c)


def _adaptive_avg_pool_matrix(n_in: int, n_out: int) -> jnp.ndarray:
    """(n_out, n_in) matrix reproducing nn.AdaptiveAvgPool1d(n_out) semantics."""
    i = jnp.arange(n_out, dtype=jnp.int32)[:, None]
    j = jnp.arange(n_in, dtype=jnp.int32)[None, :]
    start = (i * n_in) // n_out
    end = ((i + 1) * n_in + n_out - 1) // n_out
    mask = (j >= start) & (j < end)
    return mask.astype(jnp.float32) / (end - start).astype(jnp.float32)


def _reference(features, conv_weight, conv_bias, num_temporal_tokens=4):
    """Pure-JAX reference mirroring the PyTorch forward."""
    B, N, C = features.shape
    x = features.astype(jnp.float32)
    x_prev = jnp.pad(x, ((0, 0), (1, 0), (0, 0)))[:, :N, :]
    x_next = jnp.pad(x, ((0, 0), (0, 1), (0, 0)))[:, 1:, :]
    w = conv_weight[:, 0, :]                                    # (C, 3)
    y = x_prev * w[:, 0] + x * w[:, 1] + x_next * w[:, 2] + conv_bias
    y = jnp.maximum(y, 0.0)
    pool = _adaptive_avg_pool_matrix(N, num_temporal_tokens)    # (T, N)
    return jnp.einsum("tn,bnc->btc", pool, y).astype(features.dtype)


if __name__ == "__main__":
    B, N, C, T = 2, 16, 32, 4   # batch, spatial tokens, embed_dim, temporal tokens

    key = jax.random.PRNGKey(0)
    kx, kw, kb, kx2 = jax.random.split(key, 4)

    features = jax.random.normal(kx, (B, N, C), dtype=jnp.float32)

    # PyTorch Conv1d default init: U(-sqrt(k), sqrt(k)), k = groups/(in_ch*kernel) = 1/3
    bound = math.sqrt(1.0 / 3.0)
    conv_weight = jax.random.uniform(kw, (C, 1, 3), jnp.float32, -bound, bound)
    conv_bias = jax.random.uniform(kb, (C,), jnp.float32, -bound, bound)

    # 1) Even pooling (N % T == 0), roll-based shifts (N % 8 == 0).
    out = jax.block_until_ready(temporal_extractor(features, conv_weight, conv_bias, T))
    ref = _reference(features, conv_weight, conv_bias, T)
    assert out.shape == (B, T, C), out.shape
    assert jnp.allclose(out, ref, atol=1e-5, rtol=1e-5), "mismatch vs reference (even pool)"

    # 2) Uneven / overlapping AdaptiveAvgPool segments (N % T != 0) with aligned N.
    out5 = jax.block_until_ready(temporal_extractor(features, conv_weight, conv_bias, 5))
    ref5 = _reference(features, conv_weight, conv_bias, 5)
    assert out5.shape == (B, 5, C), out5.shape
    assert jnp.allclose(out5, ref5, atol=1e-5, rtol=1e-5), "mismatch vs reference (uneven pool)"

    # 3) Non-sublane-aligned N (concat fallback for the conv shifts).
    N2 = 18
    features2 = jax.random.normal(kx2, (B, N2, C), dtype=jnp.float32)
    out2 = jax.block_until_ready(temporal_extractor(features2, conv_weight, conv_bias, T))
    ref2 = _reference(features2, conv_weight, conv_bias, T)
    assert out2.shape == (B, T, C), out2.shape
    assert jnp.allclose(out2, ref2, atol=1e-5, rtol=1e-5), "mismatch vs reference (unaligned N)"

    print("KERNEL_OK")
</pallas_src>

<mosaic_0001>
module attributes {stable_mosaic.version = 11 : i64} {
  func.func @_temporal_kernel(%arg0: i32, %arg1: i32, %arg2: memref<2x16x32xf32, #tpu.memory_space<vmem>>, %arg3: memref<3x32xf32, #tpu.memory_space<vmem>>, %arg4: memref<1x32xf32, #tpu.memory_space<vmem>>, %arg5: memref<2x4x32xf32, #tpu.memory_space<vmem>>) attributes {dimension_semantics = [#tpu.dimension_semantics<parallel>, #tpu.dimension_semantics<parallel>], iteration_bounds = array<i64: 1, 1>, scalar_prefetch = 0 : i64, scratch_operands = 0 : i64, tpu.core_type = #tpu.core_type<tc>, window_params = [{transform_indices = @transform_0, window_bounds = array<i64: 2, 16, 32>}, {transform_indices = @transform_1, window_bounds = array<i64: 3, 32>}, {transform_indices = @transform_2, window_bounds = array<i64: 1, 32>}, {transform_indices = @transform_3, window_bounds = array<i64: 2, 4, 32>}]} {
    %c0 = arith.constant 0 : index
    %c0_0 = arith.constant 0 : index
    %c0_1 = arith.constant 0 : index
    %0 = vector.load %arg2[%c0, %c0_0, %c0_1] : memref<2x16x32xf32, #tpu.memory_space<vmem>>, vector<2x16x32xf32>
    %c0_2 = arith.constant 0 : index
    %c0_3 = arith.constant 0 : index
    %1 = vector.load %arg3[%c0_2, %c0_3] : memref<3x32xf32, #tpu.memory_space<vmem>>, vector<3x32xf32>
    %c0_4 = arith.constant 0 : index
    %c0_5 = arith.constant 0 : index
    %2 = vector.load %arg4[%c0_4, %c0_5] : memref<1x32xf32, #tpu.memory_space<vmem>>, vector<1x32xf32>
    %3 = tpu.iota {dimensions = array<i32: 1>} : vector<1x16x1xi32>
    %c1_i32 = arith.constant 1 : i32
    %4 = tpu.dynamic_rotate %0 by %c1_i32 dim 1 : vector<2x16x32xf32>, i32 -> vector<2x16x32xf32>
    %c0_i32 = arith.constant 0 : i32
    %5 = vector.broadcast %c0_i32 : i32 to vector<1x16x1xi32>
    %6 = arith.cmpi sgt, %3, %5 : vector<1x16x1xi32>
    %7 = arith.extui %6 : vector<1x16x1xi1> to vector<1x16x1xi32>
    %8 = arith.sitofp %7 : vector<1x16x1xi32> to vector<1x16x1xf32>
    %9 = vector.broadcast %8 : vector<1x16x1xf32> to vector<2x16x32xf32>
    %10 = arith.mulf %4, %9 : vector<2x16x32xf32>
    %c15_i32 = arith.constant 15 : i32
    %11 = tpu.dynamic_rotate %0 by %c15_i32 dim 1 : vector<2x16x32xf32>, i32 -> vector<2x16x32xf32>
    %c15_i32_6 = arith.constant 15 : i32
    %12 = vector.broadcast %c15_i32_6 : i32 to vector<1x16x1xi32>
    %13 = arith.cmpi slt, %3, %12 : vector<1x16x1xi32>
    %14 = arith.extui %13 : vector<1x16x1xi1> to vector<1x16x1xi32>
    %15 = arith.sitofp %14 : vector<1x16x1xi32> to vector<1x16x1xf32>
    %16 = vector.broadcast %15 : vector<1x16x1xf32> to vector<2x16x32xf32>
    %17 = arith.mulf %11, %16 : vector<2x16x32xf32>
    %18 = vector.extract_strided_slice %1 {offsets = [0, 0], sizes = [1, 32], strides = [1, 1]} : vector<3x32xf32> to vector<1x32xf32>
    %19 = vector.shape_cast %18 : vector<1x32xf32> to vector<1x1x32xf32>
    %20 = vector.broadcast %19 : vector<1x1x32xf32> to vector<2x16x32xf32>
    %21 = arith.mulf %10, %20 : vector<2x16x32xf32>
    %22 = vector.extract_strided_slice %1 {offsets = [1, 0], sizes = [1, 32], strides = [1, 1]} : vector<3x32xf32> to vector<1x32xf32>
    %23 = vector.shape_cast %22 : vector<1x32xf32> to vector<1x1x32xf32>
    %24 = vector.broadcast %23 : vector<1x1x32xf32> to vector<2x16x32xf32>
    %25 = arith.mulf %0, %24 : vector<2x16x32xf32>
    %26 = arith.addf %21, %25 : vector<2x16x32xf32>
    %27 = vector.extract_strided_slice %1 {offsets = [2, 0], sizes = [1, 32], strides = [1, 1]} : vector<3x32xf32> to vector<1x32xf32>
    %28 = vector.shape_cast %27 : vector<1x32xf32> to vector<1x1x32xf32>
    %29 = vector.broadcast %28 : vector<1x1x32xf32> to vector<2x16x32xf32>
    %30 = arith.mulf %17, %29 : vector<2x16x32xf32>
    %31 = arith.addf %26, %30 : vector<2x16x32xf32>
    %32 = vector.shape_cast %2 : vector<1x32xf32> to vector<1x1x32xf32>
    %33 = vector.broadcast %32 : vector<1x1x32xf32> to vector<2x16x32xf32>
    %34 = arith.addf %31, %33 : vector<2x16x32xf32>
    %cst = arith.constant 0.000000e+00 : f32
    %35 = vector.broadcast %cst : f32 to vector<2x16x32xf32>
    %36 = arith.maximumf %34, %35 : vector<2x16x32xf32>
    %37 = vector.extract_strided_slice %36 {offsets = [0, 0, 0], sizes = [2, 4, 32], strides = [1, 1, 1]} : vector<2x16x32xf32> to vector<2x4x32xf32>
    %cst_7 = arith.constant dense<0.000000e+00> : vector<2x32xf32>
    %38 = vector.multi_reduction <add>, %37, %cst_7 [1] : vector<2x4x32xf32> to vector<2x32xf32>
    %cst_8 = arith.constant 2.500000e-01 : f32
    %39 = vector.broadcast %cst_8 : f32 to vector<2x32xf32>
    %40 = arith.mulf %38, %39 : vector<2x32xf32>
    %c0_9 = arith.constant 0 : index
    %c0_10 = arith.constant 0 : index
    %c0_11 = arith.constant 0 : index
    %41 = vector.load %arg5[%c0_9, %c0_10, %c0_11] : memref<2x4x32xf32, #tpu.memory_space<vmem>>, vector<2x1x32xf32>
    %42 = vector.shape_cast %41 : vector<2x1x32xf32> to vector<2x32xf32>
    %43 = vector.shape_cast %40 : vector<2x32xf32> to vector<2x1x32xf32>
    tpu.vector_store %arg5[%c0_9, %c0_10, %c0_11], %43 {strides = array<i32>} : memref<2x4x32xf32, #tpu.memory_space<vmem>>, vector<2x1x32xf32>,
    %44 = vector.extract_strided_slice %36 {offsets = [0, 4, 0], sizes = [2, 4, 32], strides = [1, 1, 1]} : vector<2x16x32xf32> to vector<2x4x32xf32>
    %cst_12 = arith.constant dense<0.000000e+00> : vector<2x32xf32>
    %45 = vector.multi_reduction <add>, %44, %cst_12 [1] : vector<2x4x32xf32> to vector<2x32xf32>
    %cst_13 = arith.constant 2.500000e-01 : f32
    %46 = vector.broadcast %cst_13 : f32 to vector<2x32xf32>
    %47 = arith.mulf %45, %46 : vector<2x32xf32>
    %c0_14 = arith.constant 0 : index
    %c1 = arith.constant 1 : index
    %c0_15 = arith.constant 0 : index
    %48 = vector.load %arg5[%c0_14, %c1, %c0_15] : memref<2x4x32xf32, #tpu.memory_space<vmem>>, vector<2x1x32xf32>
    %49 = vector.shape_cast %48 : vector<2x1x32xf32> to vector<2x32xf32>
    %50 = vector.shape_cast %47 : vector<2x32xf32> to vector<2x1x32xf32>
    tpu.vector_store %arg5[%c0_14, %c1, %c0_15], %50 {strides = array<i32>} : memref<2x4x32xf32, #tpu.memory_space<vmem>>, vector<2x1x32xf32>,
    %51 = vector.extract_strided_slice %36 {offsets = [0, 8, 0], sizes = [2, 4, 32], strides = [1, 1, 1]} : vector<2x16x32xf32> to vector<2x4x32xf32>
    %cst_16 = arith.constant dense<0.000000e+00> : vector<2x32xf32>
    %52 = vector.multi_reduction <add>, %51, %cst_16 [1] : vector<2x4x32xf32> to vector<2x32xf32>
    %cst_17 = arith.constant 2.500000e-01 : f32
    %53 = vector.broadcast %cst_17 : f32 to vector<2x32xf32>
    %54 = arith.mulf %52, %53 : vector<2x32xf32>
    %c0_18 = arith.constant 0 : index
    %c2 = arith.constant 2 : index
    %c0_19 = arith.constant 0 : index
    %55 = vector.load %arg5[%c0_18, %c2, %c0_19] : memref<2x4x32xf32, #tpu.memory_space<vmem>>, vector<2x1x32xf32>
    %56 = vector.shape_cast %55 : vector<2x1x32xf32> to vector<2x32xf32>
    %57 = vector.shape_cast %54 : vector<2x32xf32> to vector<2x1x32xf32>
    tpu.vector_store %arg5[%c0_18, %c2, %c0_19], %57 {strides = array<i32>} : memref<2x4x32xf32, #tpu.memory_space<vmem>>, vector<2x1x32xf32>,
    %58 = vector.extract_strided_slice %36 {offsets = [0, 12, 0], sizes = [2, 4, 32], strides = [1, 1, 1]} : vector<2x16x32xf32> to vector<2x4x32xf32>
    %cst_20 = arith.constant dense<0.000000e+00> : vector<2x32xf32>
    %59 = vector.multi_reduction <add>, %58, %cst_20 [1] : vector<2x4x32xf32> to vector<2x32xf32>
    %cst_21 = arith.constant 2.500000e-01 : f32
    %60 = vector.broadcast %cst_21 : f32 to vector<2x32xf32>
    %61 = arith.mulf %59, %60 : vector<2x32xf32>
    %c0_22 = arith.constant 0 : index
    %c3 = arith.constant 3 : index
    %c0_23 = arith.constant 0 : index
    %62 = vector.load %arg5[%c0_22, %c3, %c0_23] : memref<2x4x32xf32, #tpu.memory_space<vmem>>, vector<2x1x32xf32>
    %63 = vector.shape_cast %62 : vector<2x1x32xf32> to vector<2x32xf32>
    %64 = vector.shape_cast %61 : vector<2x32xf32> to vector<2x1x32xf32>
    tpu.vector_store %arg5[%c0_22, %c3, %c0_23], %64 {strides = array<i32>} : memref<2x4x32xf32, #tpu.memory_space<vmem>>, vector<2x1x32xf32>,
    return
  }
  func.func @transform_0(%arg0: i32, %arg1: i32) -> (i32, i32, i32) {
    %c0_i32 = arith.constant 0 : i32
    %c0_i32_0 = arith.constant 0 : i32
    return %arg0, %c0_i32, %arg1 : i32, i32, i32
  }
  func.func @transform_1(%arg0: i32, %arg1: i32) -> (i32, i32) {
    %c0_i32 = arith.constant 0 : i32
    %c0_i32_0 = arith.constant 0 : i32
    return %c0_i32, %arg1 : i32, i32
  }
  func.func @transform_2(%arg0: i32, %arg1: i32) -> (i32, i32) {
    %c0_i32 = arith.constant 0 : i32
    %c0_i32_0 = arith.constant 0 : i32
    return %c0_i32, %arg1 : i32, i32
  }
  func.func @transform_3(%arg0: i32, %arg1: i32) -> (i32, i32, i32) {
    %c0_i32 = arith.constant 0 : i32
    %c0_i32_0 = arith.constant 0 : i32
    return %arg0, %c0_i32, %arg1 : i32, i32, i32
  }
}

</mosaic_0001>

<bundles_post_ra>
// kernel: tpu_custom_call.1
= control target key start
LH: loop header
LB: loop body
LE: loop exit
PB: predicated region body
PF: predicated region fallthrough
CT: control target
= control target key end

     0   :  { %8 = vsyncpa [#allocation3], 0  ;;  %s386_s0 = inlined_call_operand.hbm [shape: f32[2,16,32], index: 0, kind: input, shape index: {}]   ;;  %s387_s1 = inlined_call_operand.hbm [shape: f32[3,32], index: 1, kind: input, shape index: {}]   ;;  %s388_s2 = inlined_call_operand.vmem [shape: f32[1,32], index: 2, kind: input, shape index: {}]   ;;  %s389_s3 = inlined_call_operand.hbm [shape: f32[2,4,32], index: 3, kind: output, shape index: {}]  }
   0x1   :  { %9 = vsyncpa [#allocation6], 0 }
   0x2   :  { %10 = vsyncpa [#allocation4], 0  ;;  %s15_s14 = sshll.u32 %s386_s0, 4  ;;  %s321_s15 = smov [#allocation2]   ;;  %s16_s14 = int_to_ptr.hbm [resolvable:$true] %s15_s14 }
   0x3   :  { %s17_s16 = sshll.u32 %s321_s15, 4  ;;  %s29_s19 = sshll.u32 %s387_s1, 4  ;;  %s18_s16 = int_to_ptr.vmem [resolvable:$true] %s17_s16  ;;  %s30_s19 = int_to_ptr.hbm [resolvable:$true] %s29_s19 }
   0x4   :  { %s322_s20 = smov 128   ;;  %s323_s21 = smov 8  }
   0x5   :  { %23 = dma.hbm_to_vmem [thread:$0]  %s16_s14, 512, %s18_s16, [#allocation3], %s322_s20, %s322_s20, %s323_s21  }
   0x6   :  { %s324_s22 = smov [#allocation5]  }
   0x7   :  { %s31_s23 = sshll.u32 %s324_s22, 4  ;;  %s32_s23 = int_to_ptr.vmem [resolvable:$true] %s31_s23 }
   0x8   :  { %34 = dma.hbm_to_vmem [thread:$0]  %s30_s19, 64, %s32_s23, [#allocation6]  }
   0x9   :  { %315 = dma.done.wait [#allocation3], 512  }
   0xa   :  { %316 = vsyncadd [#allocation3], 4294966784 }
   0xb   :  { %317 = dma.done.wait [#allocation6], 64  }
   0xc   :  { %318 = vsyncadd [#allocation6], 4294967232  ;;  %v51_v0 = vlaneseq  ;;  %v45_v3 = vld [vmem:[#allocation2] sm:$0xff]  ;;  %v46_v4 = vld [vmem:[#allocation2 + $0x8] sm:$0xff]  ;;  %v325_v6 = vmov 0.0   ;;  %vm126_vm4 = vcmask 257024  }
   0xd   :  { %v49_v5 = vld [vmem:[#allocation5] sm:$0x7]  ;;  %v54_v8 = vrot.slane %v45_v3, 7  ;;  %v56_v9 = vrot.slane %v46_v4, 7  ;;  %v73_v10 = vrot.slane %v45_v3, 1  ;;  %v75_v11 = vrot.slane %v46_v4, 1 }
   0xe   :  { %v52_v1 = vshrl.u32 %v51_v0, 7  ;;  %v92_v12 = vperm.slane %v49_v5, 0  ;;  %v97_v13 = vperm.slane %v49_v5, 1  ;;  %v106_v14 = vperm.slane %v49_v5, 2  ;;  %v47_v15 = vld [vmem:[#allocation2 + $0x10] sm:$0xff]  ;;  %v48_v18 = vld [vmem:[#allocation2 + $0x18] sm:$0xff] }
   0xf   :  { %v55_v19 = vrot.slane %v47_v15, 7  ;;  %v74_v20 = vrot.slane %v47_v15, 1  ;;  %v57_v24 = vrot.slane %v48_v18, 7  ;;  %v76_v25 = vrot.slane %v48_v18, 1  ;;  %v242_v38 = vld [vmem:[%s388_s2] ss:$0 sm:$0xff] }
  0x10   :  { %vm63_vm0 = vcmp.gt.s32.totalorder %v52_v1, 0  ;;  %v53_v2 = vadd.s32 8, %v52_v1  ;;  %vm58_vm1 = vcmp.lt.s32.totalorder %v52_v1, 1  ;;  %vm77_vm2 = vcmp.lt.s32.totalorder %v52_v1, 7  ;;  %s326_s2 = smov [#allocation7]   ;;  %s218_s27 = sshll.u32 %s389_s3, 4  ;;  %s219_s27 = int_to_ptr.hbm [resolvable:$true] %s218_s27 }
  0x11   :  { %v232_v7 = vsel %vm63_vm0, 1.0, %v325_v6  ;;  %v61_v16 = vsel %vm58_vm1, %v56_v9, %v54_v8  ;;  %v78_v17 = vsel %vm77_vm2, %v73_v10, %v75_v11  ;;  %v98_v22 = vmul.f32 %v97_v13, %v45_v3  ;;  %s216_s24 = sshll.u32 %s326_s2, 4  ;;  %s327_s28 = smov 64   ;;  %s217_s24 = int_to_ptr.vmem [resolvable:$true] %s216_s24 }
  0x12   :  { %vm83_vm3 = vcmp.lt.s32.totalorder %v53_v2, 15  ;;  %v69_v21 = vmul.f32 %v232_v7, %v61_v16  ;;  %v107_v23 = vmul.f32 %v106_v14, %v78_v17  ;;  %v100_v26 = vmul.f32 %v97_v13, %v47_v15  ;;  %s328_s29 = smov 4  }
  0x13   :  { %v59_v27 = vsel %vm58_vm1, %v54_v8, %v56_v9  ;;  %v80_v28 = vsel %vm77_vm2, %v75_v11, %v73_v10  ;;  %v62_v30 = vsel %vm58_vm1, %v57_v24, %v55_v19  ;;  %v233_v31 = vsel %vm83_vm3, 1.0, %v325_v6 }
  0x14   :  { %v93_v29 = vmul.f32 %v92_v12, %v69_v21  ;;  %v94_v32 = vmul.f32 %v92_v12, %v59_v27  ;;  %v71_v33 = vmul.f32 %v232_v7, %v62_v30  ;;  %v79_v34 = vsel %vm77_vm2, %v74_v20, %v76_v25 }
  0x15   :  { %v89_v35 = vmul.f32 %v233_v31, %v80_v28  ;;  %v99_v36 = vmul.f32 %v97_v13, %v46_v4  ;;  %v109_v39 = vmul.f32 %v106_v14, %v79_v34  ;;  %v60_v40 = vsel %vm58_vm1, %v55_v19, %v57_v24 }
  0x16   :  { %v102_v37 = vadd.f32 %v98_v22, %v93_v29  ;;  %v81_v41 = vsel %vm77_vm2, %v76_v25, %v74_v20  ;;  %v95_v42 = vmul.f32 %v92_v12, %v71_v33  ;;  %v96_v47 = vmul.f32 %v92_v12, %v60_v40 }
  0x17   :  { %v103_v43 = vadd.f32 %v99_v36, %v94_v32  ;;  %v108_v44 = vmul.f32 %v106_v14, %v89_v35  ;;  %v91_v45 = vmul.f32 %v233_v31, %v81_v41  ;;  %v101_v48 = vmul.f32 %v97_v13, %v48_v18 }
  0x18   :  { %v111_v46 = vadd.f32 %v107_v23, %v102_v37  ;;  %v104_v49 = vadd.f32 %v100_v26, %v95_v42  ;;  %vm143_vm5 = vcmask 253952  }
  0x19   :  { %v112_v50 = vadd.f32 %v108_v44, %v103_v43  ;;  %v110_v51 = vmul.f32 %v106_v14, %v91_v45  ;;  %v105_v53 = vadd.f32 %v101_v48, %v96_v47 }
  0x1a   :  { %v118_v52 = vadd.f32 %v242_v38, %v111_v46  ;;  %v113_v54 = vadd.f32 %v109_v39, %v104_v49 }
  0x1b   :  { %v119_v55 = vadd.f32 %v242_v38, %v112_v50  ;;  %v114_v57 = vadd.f32 %v110_v51, %v105_v53 }
  0x1c   :  { %v122_v56 = vmax.f32 %v118_v52, 0.0  ;;  %v120_v58 = vadd.f32 %v242_v38, %v113_v54 }
  0x1d   :  { %v123_v59 = vmax.f32 %v119_v55, 0.0  ;;  %v121_v62 = vadd.f32 %v242_v38, %v114_v57 }
  0x1e   :  { %v127_v60 = vsel %vm126_vm4, %v122_v56, 0.0  ;;  %v148_v61 = vrot.slane %v122_v56, 4  ;;  %v124_v0 = vmax.f32 %v120_v58, 0.0 }
  0x1f   :  { %v128_v63 = vrot.slane %v127_v60, 4  ;;  %v170_v1 = vsel %vm126_vm4, %v123_v59, 0.0  ;;  %v190_v2 = vrot.slane %v123_v59, 4  ;;  %v125_v5 = vmax.f32 %v121_v62, 0.0 }
  0x20   :  { %v152_v3 = vsel %vm126_vm4, %v148_v61, 0.0  ;;  %v171_v4 = vrot.slane %v170_v1, 4  ;;  %v134_v7 = vsel %vm126_vm4, %v124_v0, 0.0  ;;  %v149_v9 = vrot.slane %v124_v0, 4 }
  0x21   :  { %v129_v6 = vadd.f32 %v128_v63, %v127_v60  ;;  %v153_v8 = vrot.slane %v152_v3, 4  ;;  %v135_v10 = vrot.slane %v134_v7, 4  ;;  %v177_v12 = vsel %vm126_vm4, %v125_v5, 0.0 }
  0x22   :  { %v172_v11 = vadd.f32 %v171_v4, %v170_v1  ;;  %v194_v13 = vsel %vm126_vm4, %v190_v2, 0.0  ;;  %v159_v16 = vsel %vm126_vm4, %v149_v9, 0.0  ;;  %v178_v17 = vrot.slane %v177_v12, 4 }
  0x23   :  { %v130_v14 = vrot.slane %v129_v6, 2  ;;  %v154_v15 = vadd.f32 %v153_v8, %v152_v3  ;;  %v136_v18 = vadd.f32 %v135_v10, %v134_v7  ;;  %v160_v19 = vrot.slane %v159_v16, 4 }
  0x24   :  { %v173_v20 = vrot.slane %v172_v11, 2  ;;  %v195_v21 = vrot.slane %v194_v13, 4  ;;  %v179_v24 = vadd.f32 %v178_v17, %v177_v12  ;;  %v191_v25 = vrot.slane %v125_v5, 4 }
  0x25   :  { %v131_v22 = vadd.f32 %v130_v14, %v129_v6  ;;  %v155_v23 = vrot.slane %v154_v15, 2  ;;  %v137_v26 = vrot.slane %v136_v18, 2  ;;  %v161_v27 = vadd.f32 %v160_v19, %v159_v16 }
  0x26   :  { %v174_v28 = vadd.f32 %v173_v20, %v172_v11  ;;  %v196_v29 = vadd.f32 %v195_v21, %v194_v13  ;;  %v180_v32 = vrot.slane %v179_v24, 2  ;;  %v201_v33 = vsel %vm126_vm4, %v191_v25, 0.0 }
  0x27   :  { %v132_v30 = vrot.slane %v131_v22, 1  ;;  %v156_v31 = vadd.f32 %v155_v23, %v154_v15  ;;  %v138_v34 = vadd.f32 %v137_v26, %v136_v18  ;;  %v162_v35 = vrot.slane %v161_v27, 2 }
  0x28   :  { %v175_v36 = vrot.slane %v174_v28, 1  ;;  %v197_v37 = vrot.slane %v196_v29, 2  ;;  %v181_v40 = vadd.f32 %v180_v32, %v179_v24  ;;  %v202_v41 = vrot.slane %v201_v33, 4 }
  0x29   :  { %v133_v38 = vadd.f32 %v132_v30, %v131_v22  ;;  %v157_v39 = vrot.slane %v156_v31, 1  ;;  %v139_v42 = vrot.slane %v138_v34, 1  ;;  %v163_v43 = vadd.f32 %v162_v35, %v161_v27 }
  0x2a   :  { %v176_v44 = vadd.f32 %v175_v36, %v174_v28  ;;  %v198_v45 = vadd.f32 %v197_v37, %v196_v29  ;;  %v182_v48 = vrot.slane %v181_v40, 1  ;;  %v203_v49 = vadd.f32 %v202_v41, %v201_v33 }
  0x2b   :  { %v141_v46 = vmul.f32 0.25, %v133_v38  ;;  %v158_v47 = vadd.f32 %v157_v39, %v156_v31  ;;  %v140_v50 = vadd.f32 %v139_v42, %v138_v34  ;;  %v164_v51 = vrot.slane %v163_v43, 1 }
  0x2c   :  { %v184_v52 = vmul.f32 0.25, %v176_v44  ;;  %v199_v53 = vrot.slane %v198_v45, 1  ;;  %v183_v55 = vadd.f32 %v182_v48, %v181_v40  ;;  %v204_v56 = vrot.slane %v203_v49, 2 }
  0x2d   :  { %144 = vst.msk [vmem:[#allocation7] sm:$0x1] %vm143_vm5, %v141_v46  ;;  %v166_v54 = vmul.f32 0.25, %v158_v47  ;;  %v142_v57 = vmul.f32 0.25, %v140_v50  ;;  %v165_v58 = vadd.f32 %v164_v51, %v163_v43 }
  0x2e   :  { %186 = vst.msk [vmem:[#allocation7 + $0x2] sm:$0x1] %vm143_vm5, %v184_v52  ;;  %v200_v59 = vadd.f32 %v199_v53, %v198_v45  ;;  %v185_v60 = vmul.f32 0.25, %v183_v55  ;;  %v205_v61 = vadd.f32 %v204_v56, %v203_v49 }
  0x2f   :  { %168 = vst.msk [vmem:[#allocation7 + $0x1] sm:$0x1] %vm143_vm5, %v166_v54  ;;  %v167_v62 = vmul.f32 0.25, %v165_v58 }
  0x30   :  { %145 = vst.msk [vmem:[#allocation7 + $0x4] sm:$0x1] %vm143_vm5, %v142_v57  ;;  %v208_v63 = vmul.f32 0.25, %v200_v59  ;;  %v206_v0 = vrot.slane %v205_v61, 1 }
  0x31   :  { %187 = vst.msk [vmem:[#allocation7 + $0x6] sm:$0x1] %vm143_vm5, %v185_v60 }
  0x32   :  { %169 = vst.msk [vmem:[#allocation7 + $0x5] sm:$0x1] %vm143_vm5, %v167_v62  ;;  %v207_v1 = vadd.f32 %v206_v0, %v205_v61 }
  0x33   :  { %210 = vst.msk [vmem:[#allocation7 + $0x3] sm:$0x1] %vm143_vm5, %v208_v63 }
  0x34   :  { %v209_v2 = vmul.f32 0.25, %v207_v1 }
  0x36   :  { %211 = vst.msk [vmem:[#allocation7 + $0x7] sm:$0x1] %vm143_vm5, %v209_v2 }
  0x37   :  { %224 = dma.vmem_to_hbm [thread:$0]  %s217_s24, 128, %s219_s27, [#allocation4], %s327_s28, %s327_s28, %s328_s29  }
  0x38   :  { %319 = dma.done.wait [#allocation4], 128  }
  0x39   :  { %320 = vsyncadd [#allocation4], 4294967168 }
  0x3a   :  { %229 = vsyncpa [#allocation3], 1 }
  0x3b   :  { %230 = vsyncpa [#allocation6], 1 }
  0x3c   :  { %231 = vsyncpa [#allocation4], 1 }

</bundles_post_ra>
